<compile_context>
chip_gen: v6e
topology: v6e:2x2x1
jax: 0.10.0
libtpu: 0.0.40
codegen_flags: <defaults>
</compile_context>

<pallas_src>
import functools

import jax
import jax.numpy as jnp
from jax.experimental import pallas as pl
from jax.experimental.pallas import tpu as pltpu

_MiB = 1024 * 1024


def _round_up(x, m):
    return (x + m - 1) // m * m


def _vmem_capacity_bytes():
    try:
        return int(pltpu.get_tpu_info().vmem_capacity_bytes)
    except Exception:
        return 64 * _MiB  # conservative (v7x-sized) fallback


def _choose_tile(hw, c, itemsize, target_block_bytes, lane_cap=8192):
    """Lane tile: multiple of 128, sized so one (1, c, tile) block ~= target bytes."""
    hw128 = _round_up(hw, 128)
    per_lane = max(1, c * itemsize)
    max_lanes = max(128, (target_block_bytes // per_lane) // 128 * 128)
    return min(hw128, lane_cap, max_lanes)


# ----------------------------------------------------------------------------
# Shared MLP + sigmoid, column orientation: channels live on sublanes.
#   avg_col, max_col : (c, 1) f32
#   w1 : (hidden, c) f32   (PyTorch Linear weight, as-is)
#   w2 : (c, hidden) f32   (PyTorch Linear weight, as-is)
# returns (c, 1) attention in [0, 1].
# ----------------------------------------------------------------------------
def _mlp_sigmoid_col(avg_col, max_col, w1, w2):
    pooled = jnp.concatenate([avg_col, max_col], axis=-1)              # (c, 2)
    h = jnp.dot(w1, pooled, preferred_element_type=jnp.float32)        # (hidden, 2)
    h = jnp.maximum(h, 0.0)
    out = jnp.dot(w2, h, preferred_element_type=jnp.float32)           # (c, 2)
    return jax.nn.sigmoid(out[:, 0:1] + out[:, 1:2])                   # (c, 1)


# ----------------------------------------------------------------------------
# Fused single-pass kernel: whole (c, hw) row resident in VMEM.
# ----------------------------------------------------------------------------
def _fused_kernel(x_ref, w1_ref, w2_ref, o_ref, *, inv_hw):
    x = x_ref[...].astype(jnp.float32)                                 # (1, c, hw)
    s = jnp.sum(x, axis=-1, keepdims=True)[0]                          # (c, 1)
    m = jnp.max(x, axis=-1, keepdims=True)[0]                          # (c, 1)
    att = _mlp_sigmoid_col(s * inv_hw, m, w1_ref[...], w2_ref[...])    # (c, 1)
    o_ref[...] = (x * att[None, :, :]).astype(o_ref.dtype)


# ----------------------------------------------------------------------------
# Two-pass path, pass 1: pooled stats -> MLP -> sigmoid.
# Tiny (1, c, 1) f32 accumulators; partial final tile masked in-kernel.
# ----------------------------------------------------------------------------
def _pool_mlp_kernel(x_ref, w1_ref, w2_ref, att_ref, sum_acc, max_acc,
                     *, hw, hw_tile, inv_hw, ragged):
    k = pl.program_id(1)
    n_tiles = pl.num_programs(1)

    x = x_ref[...].astype(jnp.float32)                                 # (1, c, hw_tile)

    if ragged:
        # No wrapper-side pad: OOB lanes of the last (partial) block are
        # unspecified, so mask them for BOTH reductions.  The last tile always
        # contains >=1 valid lane because (n_tiles-1)*hw_tile < hw.
        lane = jax.lax.broadcasted_iota(jnp.int32, x.shape, 2)
        valid = (k * hw_tile + lane) < hw
        x_sum = jnp.where(valid, x, 0.0)
        x_max = jnp.where(valid, x, -jnp.inf)
    else:
        x_sum = x
        x_max = x

    # Per-tile lane reduce (XLU) co-issues under the DMA; accumulators stay tiny.
    tile_sum = jnp.sum(x_sum, axis=-1, keepdims=True)                  # (1, c, 1)
    tile_max = jnp.max(x_max, axis=-1, keepdims=True)                  # (1, c, 1)

    @pl.when(k == 0)
    def _init():
        sum_acc[...] = tile_sum
        max_acc[...] = tile_max

    @pl.when(k > 0)
    def _accumulate():
        sum_acc[...] = sum_acc[...] + tile_sum
        max_acc[...] = jnp.maximum(max_acc[...], tile_max)

    @pl.when(k == n_tiles - 1)
    def _finalize():
        att = _mlp_sigmoid_col(sum_acc[0] * inv_hw, max_acc[0],
                               w1_ref[...], w2_ref[...])               # (c, 1)
        att_ref[...] = att[None, :, :]                                 # (1, c, 1)


# ----------------------------------------------------------------------------
# Two-pass path, pass 2: lane-dense streaming broadcast multiply.
# ----------------------------------------------------------------------------
def _scale_kernel(x_ref, att_ref, o_ref):
    x = x_ref[...].astype(jnp.float32)                                 # (1, c, tile)
    o_ref[...] = (x * att_ref[...]).astype(o_ref.dtype)                # att: (1, c, 1)


# ----------------------------------------------------------------------------
# Wrapper
# ----------------------------------------------------------------------------
def channel_attention_mlp(x_nchw, w1, w2, *, force_two_pass=False, tile_cap=None):
    """x_nchw: (b, c, h, w).  w1: (hidden, c), w2: (c, hidden) — PyTorch Linear weights."""
    b, c, h, w = x_nchw.shape
    hidden = w1.shape[0]
    hw = h * w
    inv_hw = 1.0 / hw
    itemsize = jnp.dtype(x_nchw.dtype).itemsize

    # Free reshapes (merge/split of trailing dims only).  x keeps its dtype
    # end-to-end (bf16 inputs stay bf16 in HBM -> half the bytes moved).
    x_flat = x_nchw.reshape(b, c, hw)
    w1f = w1.astype(jnp.float32)
    w2f = w2.astype(jnp.float32)

    cap = _vmem_capacity_bytes()
    # ~4 MiB x-blocks on v7x (64 MiB VMEM), ~8 MiB on v5e/v6e (128 MiB VMEM).
    target_block_bytes = 4 * _MiB if cap <= 64 * _MiB else 8 * _MiB
    vmem_limit = max(32 * _MiB, min(cap * 3 // 4, 100 * _MiB))
    lane_cap = tile_cap if tile_cap is not None else 8192

    bytes_x = b * c * hw * itemsize
    bytes_w = 2 * c * hidden * 4
    row_bytes = c * hw * itemsize

    # ---- Fused single-pass path (row fits in VMEM) --------------------------
    if (not force_two_pass) and row_bytes <= target_block_bytes:
        cost = pl.CostEstimate(
            flops=3 * b * c * hw + 8 * b * c * hidden,
            transcendentals=b * c,
            bytes_accessed=2 * bytes_x + bytes_w)
        out_flat = pl.pallas_call(
            functools.partial(_fused_kernel, inv_hw=inv_hw),
            out_shape=jax.ShapeDtypeStruct((b, c, hw), x_flat.dtype),
            grid=(b,),
            in_specs=[
                pl.BlockSpec((1, c, hw), lambda ib: (ib, 0, 0)),
                pl.BlockSpec((hidden, c), lambda ib: (0, 0)),
                pl.BlockSpec((c, hidden), lambda ib: (0, 0)),
            ],
            out_specs=pl.BlockSpec((1, c, hw), lambda ib: (ib, 0, 0)),
            compiler_params=pltpu.CompilerParams(
                dimension_semantics=("parallel",),
                vmem_limit_bytes=vmem_limit),
            cost_estimate=cost,
        )(x_flat, w1f, w2f)
        return out_flat.reshape(b, c, h, w)

    # ---- Two-pass path -------------------------------------------------------
    # Pass 1: pooled stats + MLP + sigmoid.
    tile1 = _choose_tile(hw, c, itemsize, target_block_bytes, lane_cap)
    n1 = pl.cdiv(hw, tile1)
    ragged1 = (hw % tile1) != 0

    cost1 = pl.CostEstimate(
        flops=2 * b * c * hw + 8 * b * c * hidden,
        transcendentals=b * c,
        bytes_accessed=bytes_x + bytes_w + b * c * 4)

    att = pl.pallas_call(
        functools.partial(_pool_mlp_kernel, hw=hw, hw_tile=tile1,
                          inv_hw=inv_hw, ragged=ragged1),
        out_shape=jax.ShapeDtypeStruct((b, c, 1), jnp.float32),
        grid=(b, n1),
        in_specs=[
            pl.BlockSpec((1, c, tile1), lambda ib, k: (ib, 0, k)),
            pl.BlockSpec((hidden, c), lambda ib, k: (0, 0)),
            pl.BlockSpec((c, hidden), lambda ib, k: (0, 0)),
        ],
        out_specs=pl.BlockSpec((1, c, 1), lambda ib, k: (ib, 0, 0)),
        scratch_shapes=[
            pltpu.VMEM((1, c, 1), jnp.float32),   # running sum
            pltpu.VMEM((1, c, 1), jnp.float32),   # running max
        ],
        compiler_params=pltpu.CompilerParams(
            dimension_semantics=("parallel", "arbitrary"),
            vmem_limit_bytes=vmem_limit),
        cost_estimate=cost1,
    )(x_flat, w1f, w2f)

    # Pass 2: streaming multiply.  Tile is chosen independently of pass 1
    # (pass 2 has no large scratch, only the double-buffered x/out blocks).
    tile2 = _choose_tile(hw, c, itemsize, target_block_bytes, lane_cap)
    n2 = pl.cdiv(hw, tile2)

    cost2 = pl.CostEstimate(
        flops=b * c * hw,
        transcendentals=0,
        bytes_accessed=2 * bytes_x + b * c * 4)

    out_flat = pl.pallas_call(
        _scale_kernel,
        out_shape=jax.ShapeDtypeStruct((b, c, hw), x_flat.dtype),
        grid=(b, n2),
        in_specs=[
            pl.BlockSpec((1, c, tile2), lambda ib, j: (ib, 0, j)),
            pl.BlockSpec((1, c, 1), lambda ib, j: (ib, 0, 0)),
        ],
        out_specs=pl.BlockSpec((1, c, tile2), lambda ib, j: (ib, 0, j)),
        compiler_params=pltpu.CompilerParams(
            dimension_semantics=("parallel", "parallel"),
            vmem_limit_bytes=vmem_limit),
        cost_estimate=cost2,
    )(x_flat, att)

    return out_flat.reshape(b, c, h, w)


def channel_attention_mlp_ref(x, w1, w2):
    """Pure-JAX (f32) reference mirroring the PyTorch forward."""
    xf = x.astype(jnp.float32)
    avg = jnp.mean(xf, axis=(2, 3))                      # (b, c)
    mx = jnp.max(xf, axis=(2, 3))                        # (b, c)

    def mlp(p):
        return jnp.maximum(p @ w1.T, 0.0) @ w2.T

    att = jax.nn.sigmoid(mlp(avg) + mlp(mx))             # (b, c)
    return xf * att[:, :, None, None]


if __name__ == "__main__":
    ratio = 16
    key = jax.random.PRNGKey(0)

    cases = [
        # (batch, channels, spatial, dtype, force_two_pass, tile_cap)
        (2, 32, 16, jnp.float32, False, None),    # fused path, lane-aligned hw=256
        (2, 32, 7, jnp.float32, False, None),     # fused path, ragged hw=49
        (2, 32, 16, jnp.float32, True, 128),      # two-pass, 2 accumulation tiles
        (2, 32, 7, jnp.float32, True, 128),       # two-pass, masked partial tile
        (2, 32, 16, jnp.bfloat16, False, None),   # bf16 I/O (halved HBM traffic)
    ]

    for batch, channels, spatial, dtype, force_two_pass, tile_cap in cases:
        hidden = channels // ratio
        kx, k1, k2, key = jax.random.split(key, 4)

        x = jax.random.normal(
            kx, (batch, channels, spatial, spatial), jnp.float32).astype(dtype)
        # PyTorch Linear weight shapes: (out, in), bias=False
        w1 = jax.random.normal(k1, (hidden, channels), jnp.float32) * 0.1
        w2 = jax.random.normal(k2, (channels, hidden), jnp.float32) * 0.1

        out = jax.block_until_ready(
            channel_attention_mlp(x, w1, w2,
                                  force_two_pass=force_two_pass,
                                  tile_cap=tile_cap))
        ref = channel_attention_mlp_ref(x, w1, w2)

        assert out.shape == x.shape and out.dtype == x.dtype
        tol = 5e-2 if dtype == jnp.bfloat16 else 1e-5
        assert jnp.allclose(out.astype(jnp.float32), ref, atol=tol, rtol=tol), (
            f"mismatch vs reference for case "
            f"{(batch, channels, spatial, str(dtype), force_two_pass)}")

    print("KERNEL_OK")
</pallas_src>

<mosaic_0001>
module attributes {stable_mosaic.version = 11 : i64} {
  func.func @_fused_kernel(%arg0: i32, %arg1: memref<1x32x256xf32, #tpu.memory_space<vmem>>, %arg2: memref<2x32xf32, #tpu.memory_space<vmem>>, %arg3: memref<32x2xf32, #tpu.memory_space<vmem>>, %arg4: memref<1x32x256xf32, #tpu.memory_space<vmem>>) attributes {dimension_semantics = [#tpu.dimension_semantics<parallel>], iteration_bounds = array<i64: 2>, scalar_prefetch = 0 : i64, scratch_operands = 0 : i64, tpu.core_type = #tpu.core_type<tc>, window_params = [{transform_indices = @transform_0, window_bounds = array<i64: 1, 32, 256>}, {pipeline_mode = #tpu.pipeline_mode<synchronous>, transform_indices = @transform_1, window_bounds = array<i64: 2, 32>}, {pipeline_mode = #tpu.pipeline_mode<synchronous>, transform_indices = @transform_2, window_bounds = array<i64: 32, 2>}, {transform_indices = @transform_3, window_bounds = array<i64: 1, 32, 256>}]} {
    %c0 = arith.constant 0 : index
    %c0_0 = arith.constant 0 : index
    %c0_1 = arith.constant 0 : index
    %0 = vector.load %arg1[%c0, %c0_0, %c0_1] : memref<1x32x256xf32, #tpu.memory_space<vmem>>, vector<1x32x256xf32>
    %cst = arith.constant dense<0.000000e+00> : vector<1x32xf32>
    %1 = vector.multi_reduction <add>, %0, %cst [2] : vector<1x32x256xf32> to vector<1x32xf32>
    %2 = vector.shape_cast %1 : vector<1x32xf32> to vector<1x32x1xf32>
    %3 = vector.shape_cast %2 : vector<1x32x1xf32> to vector<32x1xf32>
    %cst_2 = arith.constant dense<0xFF800000> : vector<1x32xf32>
    %4 = vector.multi_reduction <maximumf>, %0, %cst_2 [2] : vector<1x32x256xf32> to vector<1x32xf32>
    %5 = vector.shape_cast %4 : vector<1x32xf32> to vector<1x32x1xf32>
    %6 = vector.shape_cast %5 : vector<1x32x1xf32> to vector<32x1xf32>
    %cst_3 = arith.constant 3.906250e-03 : f32
    %7 = vector.broadcast %cst_3 : f32 to vector<32x1xf32>
    %8 = arith.mulf %3, %7 : vector<32x1xf32>
    %c0_4 = arith.constant 0 : index
    %c0_5 = arith.constant 0 : index
    %9 = vector.load %arg2[%c0_4, %c0_5] : memref<2x32xf32, #tpu.memory_space<vmem>>, vector<2x32xf32>
    %c0_6 = arith.constant 0 : index
    %c0_7 = arith.constant 0 : index
    %10 = vector.load %arg3[%c0_6, %c0_7] : memref<32x2xf32, #tpu.memory_space<vmem>>, vector<32x2xf32>
    %11 = tpu.concatenate %8, %6 in 1 : vector<32x1xf32>, vector<32x1xf32> -> vector<32x2xf32>
    %cst_8 = arith.constant dense<0.000000e+00> : vector<2x2xf32>
    %12 = tpu.matmul %9, %11, %cst_8 {dimension_numbers = #tpu.dot_dimension_numbers<[1], [0], [0], [1], [0, 0, 1, 1], [], []>} : vector<2x32xf32>, vector<32x2xf32>, vector<2x2xf32> -> vector<2x2xf32>
    %cst_9 = arith.constant 0.000000e+00 : f32
    %13 = vector.broadcast %cst_9 : f32 to vector<2x2xf32>
    %14 = arith.maximumf %12, %13 : vector<2x2xf32>
    %cst_10 = arith.constant dense<0.000000e+00> : vector<32x2xf32>
    %15 = tpu.matmul %10, %14, %cst_10 {dimension_numbers = #tpu.dot_dimension_numbers<[1], [0], [0], [1], [0, 0, 1, 1], [], []>} : vector<32x2xf32>, vector<2x2xf32>, vector<32x2xf32> -> vector<32x2xf32>
    %16 = vector.extract_strided_slice %15 {offsets = [0, 0], sizes = [32, 1], strides = [1, 1]} : vector<32x2xf32> to vector<32x1xf32>
    %17 = vector.extract_strided_slice %15 {offsets = [0, 1], sizes = [32, 1], strides = [1, 1]} : vector<32x2xf32> to vector<32x1xf32>
    %18 = arith.addf %16, %17 : vector<32x1xf32>
    %19 = arith.negf %18 : vector<32x1xf32>
    %20 = math.exp %19 : vector<32x1xf32>
    %cst_11 = arith.constant 1.000000e+00 : f32
    %21 = vector.broadcast %cst_11 : f32 to vector<32x1xf32>
    %22 = arith.addf %21, %20 : vector<32x1xf32>
    %23 = arith.divf %21, %22 : vector<32x1xf32>
    %24 = vector.shape_cast %23 : vector<32x1xf32> to vector<1x32x1xf32>
    %25 = vector.broadcast %24 : vector<1x32x1xf32> to vector<1x32x256xf32>
    %26 = arith.mulf %0, %25 : vector<1x32x256xf32>
    %c0_12 = arith.constant 0 : index
    %c0_13 = arith.constant 0 : index
    %c0_14 = arith.constant 0 : index
    %27 = vector.load %arg4[%c0_12, %c0_13, %c0_14] : memref<1x32x256xf32, #tpu.memory_space<vmem>>, vector<1x32x256xf32>
    tpu.vector_store %arg4[%c0_12, %c0_13, %c0_14], %26 {strides = array<i32>} : memref<1x32x256xf32, #tpu.memory_space<vmem>>, vector<1x32x256xf32>,
    return
  }
  func.func @transform_0(%arg0: i32) -> (i32, i32, i32) {
    %c0_i32 = arith.constant 0 : i32
    %c0_i32_0 = arith.constant 0 : i32
    %c0_i32_1 = arith.constant 0 : i32
    return %arg0, %c0_i32, %c0_i32_0 : i32, i32, i32
  }
  func.func @transform_1(%arg0: i32) -> (i32, i32) {
    %c0_i32 = arith.constant 0 : i32
    %c0_i32_0 = arith.constant 0 : i32
    %c0_i32_1 = arith.constant 0 : i32
    return %c0_i32, %c0_i32_0 : i32, i32
  }
  func.func @transform_2(%arg0: i32) -> (i32, i32) {
    %c0_i32 = arith.constant 0 : i32
    %c0_i32_0 = arith.constant 0 : i32
    %c0_i32_1 = arith.constant 0 : i32
    return %c0_i32, %c0_i32_0 : i32, i32
  }
  func.func @transform_3(%arg0: i32) -> (i32, i32, i32) {
    %c0_i32 = arith.constant 0 : i32
    %c0_i32_0 = arith.constant 0 : i32
    %c0_i32_1 = arith.constant 0 : i32
    return %arg0, %c0_i32, %c0_i32_0 : i32, i32, i32
  }
}

</mosaic_0001>

<bundles_post_ra>
// kernel: tpu_custom_call.1
= control target key start
LH: loop header
LB: loop body
LE: loop exit
PB: predicated region body
PF: predicated region fallthrough
CT: control target
= control target key end

     0   :  { %8 = vsyncpa [#allocation3], 0  ;;  %s1047_s0 = inlined_call_operand.hbm [shape: f32[2,32,256], index: 0, kind: input, shape index: {}]   ;;  %s1048_s1 = inlined_call_operand.vmem [shape: f32[2,32], index: 1, kind: input, shape index: {}]   ;;  %s1049_s2 = inlined_call_operand.vmem [shape: f32[32,2], index: 2, kind: input, shape index: {}]   ;;  %s1050_s3 = inlined_call_operand.hbm [shape: f32[2,32,256], index: 3, kind: output, shape index: {}]  }
   0x1   :  { %10 = vsyncpa [#allocation3 + $0x1], 0 }
   0x2   :  { %11 = vsyncpa [#allocation4], 0 }
   0x3   :  { %13 = vsyncpa [#allocation4 + $0x1], 0  ;;  %s830_s12 = smov 0   ;;  %s832_s13 = smov 0  }
   0x4   :  { %s834_s14 = smov 0   ;;  %s836_s15 = smov 0  }
   0x5 LB: > { %s851_s16 = sadd.s32 4294967295, %s798_s15   ;;  %s579_s17 = sadd.s32 4294967294, %s798_s15   ;;  %s798_s15 = sphi %s836_s15, %s1065_s15   ;;  %s794_s14 = sphi %s834_s14, %s1064_s14   ;;  %s790_s13 = sphi %s832_s13, %s1063_s13   ;;  %s786_s12 = sphi %s830_s12, %s1062_s12  }
   0x6   : > { %s855_s18 = sadd.s32 1, %s798_s15   ;;  %s26_s19 = sadd.s32 1, %s794_s14 }
   0x7   : > { %s23_s20 = ssub.s32 %s798_s15, %s855_s18  ;;  %p33_p0 = scmp.ne.s32.totalorder %s794_s14, %s790_s13 }
   0x8   : > { %p24_p1 = scmp.eq.s32.totalorder %s23_s20, 0  ;;  %p34_p2 = scmp.eq.s32.totalorder %s798_s15, 0 }
   0x9   : > { %p39_p3 = scmp.ne.s32.totalorder %s790_s13, %s786_s12  ;;  %p40_p4 = scmp.eq.s32.totalorder %s851_s16, 0 }
   0xa   : > { %s867_s21 = scalar_select %p24_p1, %s794_s14, %s26_s19  }
   0xb   : > { %p869_p5 = por %p34_p2, %p33_p0  ;;  %p873_p6 = por %p40_p4, %p39_p3 }
   0xc   : > { %p105_p7 = scmp.eq.s32.totalorder %s851_s16, 1  ;;  %p111_p8 = scmp.eq.s32.totalorder %s579_s17, 1 }
   0xd   : > { %s1054_s23 = scalar_select %p873_p6, 1, 0 }
   0xe   : > { %p646_p10 = scmp.lt.s32.totalorder %s798_s15, 2  ;;  %p880_p11 = por %p105_p7, %p33_p0 }
   0xf   : > { %p884_p12 = por %p111_p8, %p39_p3  ;;  %s137_s26 = sand.u32 1, %s794_s14  }
  0x10   : > { %s1055_s24 = scalar_select %p880_p11, 1, 0 }
  0x11   : > { %s1056_s25 = scalar_select %p884_p12, 1, 0 }
  0x12   : > { %s603_s27 = sshll.u32 %s798_s15, 10  ;;  %s582_s28 = sshll.u32 %s137_s26, 6 }
  0x13   : > { %s893_s4 = scalar_lea.hbm %s1047_s0, %s603_s27  ;;  %s141_s5 = scalar_lea.vmem [#allocation2], %s582_s28 }
  0x14   : > { %s148_s6 = sshll.u32 %s141_s5, 4  ;;  %p897_p13 = pnand %p646_p10, %p869_p5  ;;  %s901_s6 = int_to_ptr.vmem [resolvable:$true] %s148_s6 }
  0x15   : > { %s903_s8 = scalar_lea.sflag [#allocation3], %s137_s26  ;;  %s706_s9 = scalar_lea.hbm %s893_s4, 1024 }
  0x16   : > { %p707_p0 = scmp.ne.s32.totalorder %s893_s4, %s706_s9  ;;  %p708_p1 = pneg %p897_p13 }
  0x17   : > { %s711_s17 = scalar_lea.hbm %s1047_s0, 2048  ;;  %p712_p4 = scmp.lt.s32.totalorder %s893_s4, %s1047_s0 }
  0x18   : > { %p709_p2 = pnand %p708_p1, %p707_p0  ;;  %p713_p5 = scmp.lt.s32.totalorder %s711_s17, %s706_s9 }
  0x1a   : > { %p710_p3 = pneg %p709_p2  ;;  %p714_p7 = por %p713_p5, %p712_p4 }
  0x1c   : > { %p715_p8 = pnand %p714_p7, %p710_p3 }
  0x1e   : > { %718 = shalt.err (!%p715_p8)
}
  0x1f   : > { %s719_s22 = scalar_lea.vmem %s901_s6, 1024  ;;  %s800_s26 = smov [#allocation2]  }
  0x20   : > { %p720_p10 = scmp.ne.s32.totalorder %s901_s6, %s719_s22  ;;  %s724_s27 = sshll.u32 %s800_s26, 4  ;;  %s725_s27 = int_to_ptr.vmem [resolvable:$false] %s724_s27 }
  0x21   : > { %s726_s28 = scalar_lea.vmem %s725_s27, 2048  ;;  %p727_p2 = scmp.lt.s32.totalorder %s901_s6, %s725_s27 }
  0x22   : > { %p722_p9 = pnand %p720_p10, %p708_p1  ;;  %p728_p12 = scmp.lt.s32.totalorder %s726_s28, %s719_s22 }
  0x24   : > { %p723_p0 = pneg %p722_p9  ;;  %p729_p11 = por %p728_p12, %p727_p2 }
  0x26   : > { %p730_p6 = pnand %p729_p11, %p723_p0 }
  0x28   : > { %733 = shalt.err (!%p730_p6)
}
  0x29   : > { %s801_s29 = smov 256   ;;  %s802_s30 = smov 16  }
  0x2a   : > { %641 = dma.hbm_to_vmem [thread:$0]  (!%p897_p13), %s893_s4, 1024, %s901_s6, %s903_s8, %s801_s29, %s801_s29, %s802_s30  }
  0x2b   : > { %p585_p9 = scmp.ge.s32.totalorder %s798_s15, 1  ;;  %p156_p1 = scmp.lt.s32.totalorder %s798_s15, 3 }
  0x2d   : > { %p157_p3 = pnand %p585_p9, %p156_p1 }
  0x2e   : > { %s927_s5 = sand.u32 (!%p157_p3), 1, %s790_s13   ;;  %p1058_p6 = scmp.ne.s32.totalorder (!%p157_p3), %s1054_s23, 0 }
  0x2f   : > { %160 = sbr.rel (%p157_p3) target bundleno = 899 (0x383), region = 32  ;;  %s586_s9 = sshll.u32 (!%p157_p3), %s927_s5, 6 }
  0x30   : > { %s163_s10 = scalar_lea.sflag (!%p157_p3), [#allocation3], %s927_s5  ;;  %s166_s11 = scalar_lea.vmem (!%p157_p3), [#allocation2], %s586_s9 }
  0x34   : > { %777 = dma.done.wait (%p1058_p6), %s163_s10, 1024  }
  0x35   : > { %779 = vsyncadd (%p1058_p6), %s163_s10, 4294966272  ;;  %v937_v0 = vld [vmem:[%s166_s11 + $0x30] sm:$0xff]  ;;  %v939_v1 = vld [vmem:[%s166_s11 + $0x38] sm:$0xff]  ;;  %v803_v16 = vmov 0.0   ;;  %vm804_vm0 = vmmov 0   ;;  %vm230_vm1 = vcmask 7168  }
  0x36   : > { %v941_v2 = vld [vmem:[%s166_s11 + $0x20] sm:$0xff]  ;;  %v218_v3 = vmax.f32 %v937_v0, %v939_v1  ;;  %v206_v4 = vadd.f32 %v939_v1, %v937_v0  ;;  %v947_v5 = vld [vmem:[%s166_s11 + $0x28] sm:$0xff]  ;;  %v949_v6 = vld [vmem:[%s166_s11 + $0x10] sm:$0xff]  ;;  %615 = vmatprep.subr.mxu0 %v803_v16  ;;  %623 = vmatprep.mubr.msk.f32.mxu0 %vm804_vm0, %v803_v16  ;;  %vm235_vm2 = vcmask 261120   ;;  %vm310_vm3 = vcmask 15360   ;;  %s805_s27 = smov 127  }
  0x37   : > { %v951_v7 = vld [vmem:[%s166_s11 + $0x18] sm:$0xff]  ;;  %v203_v8 = vadd.f32 %v947_v5, %v941_v2  ;;  %v957_v10 = vld [vmem:[%s166_s11] sm:$0xff]  ;;  %v959_v11 = vld [vmem:[%s166_s11 + $0x8] sm:$0xff]  ;;  %v215_v12 = vmax.f32 %v941_v2, %v947_v5  ;;  %vm323_vm4 = vcmask 1041408   ;;  %v806_v45 = vmov 0   ;;  %s188_s28 = scalar_lea.vmem [#allocation5], %s586_s9 }
  0x38   : > { %219 = vmax.xlane.f32.xlu1 %v218_v3  ;;  %207 = vadd.xlane.f32.xlu0 %v206_v4  ;;  %v200_v9 = vadd.f32 %v951_v7, %v949_v6  ;;  %v197_v13 = vadd.f32 %v959_v11, %v957_v10  ;;  %v212_v14 = vmax.f32 %v949_v6, %v951_v7  ;;  %v225_v32 = vld [vmem:[%s1048_s1] sm:$0x3]  ;;  %v227_v38 = vld [vmem:[%s1049_s2 + $0x8] sm:$0xff]  ;;  %v228_v39 = vld [vmem:[%s1049_s2 + $0x10] sm:$0xff]  ;;  %s506_s29 = sshll.u32 %s188_s28, 4  ;;  %s604_s30 = sshll.u32 %s851_s16, 10  ;;  %s997_s29 = int_to_ptr.vmem [resolvable:$true] %s506_s29 }
  0x39   : > { %v209_v15 = vmax.f32 %v957_v10, %v959_v11  ;;  %v226_v34 = vld [vmem:[%s1049_s2] sm:$0xff]  ;;  %v229_v40 = vld [vmem:[%s1049_s2 + $0x18] sm:$0xff]  ;;  %688 = vset.pattern.permute.xlu1 %v806_v45  ;;  %689 = vset.pattern.permute.xlu0 %v806_v45  ;;  %s1002_s11 = scalar_lea.hbm %s1050_s3, %s604_s30  ;;  %s493_s16 = scalar_lea.sflag [#allocation4], %s927_s5 }
  0x3a   : > { %628 = vmatprep.mubr.msk.f32.mxu1 %vm310_vm3, %v226_v34  ;;  %s734_s23 = scalar_lea.vmem %s997_s29, 1024  ;;  %p1059_p12 = scmp.ne.s32.totalorder %s1055_s24, 0 }
  0x3b   : > { %p735_p11 = scmp.ne.s32.totalorder %s997_s29, %s734_s23  ;;  %s807_s4 = smov [#allocation5]  }
  0x3c   : > { %204 = vadd.xlane.f32.xlu0 %v203_v8  ;;  %201 = vadd.xlane.f32.xlu1 %v200_v9  ;;  %s738_s6 = sshll.u32 %s807_s4, 4  ;;  %s739_s6 = int_to_ptr.vmem [resolvable:$false] %s738_s6 }
  0x3d   : > { %p736_p13 = pnand %p735_p11, %p1059_p12  ;;  %s740_s7 = scalar_lea.vmem %s739_s6, 2048 }
  0x3e   : > { %p741_p5 = scmp.lt.s32.totalorder %s997_s29, %s739_s6  ;;  %p742_p7 = scmp.lt.s32.totalorder %s740_s7, %s734_s23 }
  0x3f   : > { %p737_p4 = pneg %p736_p13 }
  0x40   : > { %216 = vmax.xlane.f32.xlu0 %v215_v12  ;;  %198 = vadd.xlane.f32.xlu1 %v197_v13  ;;  %p743_p8 = por %p742_p7, %p741_p5 }
  0x42   : > { %p744_p10 = pnand %p743_p8, %p737_p4 }
  0x44   : > { %213 = vmax.xlane.f32.xlu0 %v212_v14  ;;  %210 = vmax.xlane.f32.xlu1 %v209_v15 }
  0xc1   : > { %v220_v17 = vpop.xlane.xlu1 %219  ;;  %v208_v18 = vpop.xlane.xlu0 %207 }
  0xc2   : > { %v224_v19 = vmul.f32 0.00390625, %v208_v18 }
  0xc4   : > { %v234_v20 = vsel %vm230_vm1, %v224_v19, %v220_v17 }
  0xc5   : > { %616 = vmatpush3.msra.mxu0 %v234_v20  ;;  %v205_v21 = vpop.xlane.xlu0 %204  ;;  %v202_v22 = vpop.xlane.xlu1 %201 }
  0xc6   : > { %617 = vmatprep.subr.mxu0 %v803_v16  ;;  %v223_v23 = vmul.f32 0.00390625, %v205_v21  ;;  %v222_v27 = vmul.f32 0.00390625, %v202_v22 }
  0xc9   : > { %v217_v24 = vpop.xlane.xlu0 %216  ;;  %v199_v25 = vpop.xlane.xlu1 %198 }
  0xca   : > { %v233_v26 = vsel %vm230_vm1, %v223_v23, %v217_v24  ;;  %v221_v28 = vmul.f32 0.00390625, %v199_v25 }
  0xcb   : > { %618 = vmatpush3.msra.mxu0 %v233_v26 }
  0xcc   : > { %619 = vmatprep.subr.mxu0 %v803_v16 }
  0xcd   : > { %v214_v29 = vpop.xlane.xlu0 %213  ;;  %v211_v30 = vpop.xlane.xlu1 %210 }
  0xce   : > { %v232_v31 = vsel %vm230_vm1, %v222_v27, %v214_v29  ;;  %v231_v33 = vsel %vm230_vm1, %v221_v28, %v211_v30 }
  0xcf   : > { %620 = vmatpush3.msra.mxu0 %v232_v31 }
  0xd0   : > { %621 = vmatprep.subr.mxu0 %v803_v16 }
  0xd1   : > { %622 = vmatpush3.msra.mxu0 %v231_v33 }
  0xd2   : > { %624 = vmatmul.mubr.msk.f32.vlgmr.msra.gmra.mxu0 %vm235_vm2, %v225_v32 }
 0x192   : > { %v305_v35 = vpop.f32.mrf.mxu0 }
 0x193   : > { %v309_v36 = vmax.f32 %v305_v35, 0.0 }
 0x194   : > { %v625_v37 = vpop.f32.mrf.mxu0 }
 0x195   : > { %626 = vmatprep.subr.msk.mxu1 %vm323_vm4, %v309_v36 }
 0x196   : > { %627 = vmatpush3.msk.msra.mxu1 %vm323_vm4, %v309_v36 }
 0x197   : > { %629 = vmatmul.mubr.msk.f32.vlgmr.msra.gmra.mxu1 %vm310_vm3, %v227_v38 }
 0x198   : > { %631 = vmatprep.mubr.msk.f32.mxu1 %vm310_vm3, %v228_v39 }
 0x19b   : > { %632 = vmatmul.mubr.msk.f32.gmra.mxu1 %vm310_vm3, %v229_v40 }
 0x257   : > { %v630_v41 = vpop.f32.mrf.mxu1 }
 0x258   : > { %418 = vrot.lane.b32.xlu1 %v630_v41, %s805_s27 }
 0x259   : > { %v393_v42 = vpop.f32.mrf.mxu1 }
 0x25a   : > { %416 = vrot.lane.b32.xlu0 %v393_v42, %s805_s27 }
 0x25b   : > { %v633_v43 = vpop.f32.mrf.mxu1 }
 0x25d   : > { %v403_v44 = vpop.f32.mrf.mxu1 }
 0x25e   : > { %420 = vrot.lane.b32.xlu1 %v403_v44, %s805_s27 }
 0x262   : > { %422 = vrot.lane.b32.xlu1 %v633_v43, %s805_s27 }
 0x2ca   : > { %v419_v46 = vpop.permute.xlu1 %418 }
 0x2cb   : > { %v429_v47 = vadd.f32 %v630_v41, %v419_v46 }
 0x2cc   : > { %v417_v48 = vpop.permute.xlu0 %416 }
 0x2cd   : > { %v595_v49 = vmul.f32 -1.442695, %v429_v47  ;;  %v428_v50 = vadd.f32 %v417_v48, %v393_v42 }
 0x2cf   : > { %690 = vpow2.f32 %v595_v49  ;;  %v594_v51 = vmul.f32 -1.442695, %v428_v50 }
 0x2d0   : > { %v421_v52 = vpop.permute.xlu1 %420 }
 0x2d1   : > { %692 = vpow2.f32 %v594_v51  ;;  %v430_v53 = vadd.f32 %v421_v52, %v403_v44 }
 0x2d3   : > { %v596_v54 = vmul.f32 -1.442695, %v430_v53 }
 0x2d4   : > { %v423_v55 = vpop.permute.xlu1 %422 }
 0x2d5   : > { %694 = vpow2.f32 %v596_v54  ;;  %v431_v56 = vadd.f32 %v633_v43, %v423_v55 }
 0x2d7   : > { %v597_v57 = vmul.f32 -1.442695, %v431_v56 }
 0x2d9   : > { %696 = vpow2.f32 %v597_v57 }
 0x2dc   : > { %v691_v58 = vpop.eup %690 }
 0x2dd   : > { %v445_v59 = vadd.f32 1.0, %v691_v58 }
 0x2de   : > { %v693_v60 = vpop.eup %692 }
 0x2df   : > { %698 = vrcp.f32 %v445_v59  ;;  %v444_v61 = vadd.f32 1.0, %v693_v60 }
 0x2e1   : > { %700 = vrcp.f32 %v444_v61 }
 0x2e2   : > { %v695_v62 = vpop.eup %694 }
 0x2e3   : > { %v446_v63 = vadd.f32 1.0, %v695_v62 }
 0x2e5   : > { %702 = vrcp.f32 %v446_v63 }
 0x2e6   : > { %v697_v3 = vpop.eup %696 }
 0x2e7   : > { %v447_v4 = vadd.f32 1.0, %v697_v3 }
 0x2e9   : > { %704 = vrcp.f32 %v447_v4 }
 0x2ec   : > { %v699_v8 = vpop.eup %698 }
 0x2ed   : > { %463 = vperm.xlu1 %688, %v699_v8  }
 0x2ee   : > { %v701_v9 = vpop.eup %700 }
 0x2ef   : > { %458 = vperm.xlu0 %689, %v701_v9  }
 0x2f2   : > { %v703_v12 = vpop.eup %702 }
 0x2f3   : > { %468 = vperm.xlu1 %688, %v703_v12  }
 0x2f6   : > { %v705_v13 = vpop.eup %704 }
 0x2f7   : > { %473 = vperm.xlu0 %689, %v705_v13  }
 0x368   : > { %v464_v14 = vpop.permute.xlu1 %463 }
 0x369   : > { %v478_v15 = vmul.f32 %v464_v14, %v949_v6  ;;  %v479_v16 = vmul.f32 %v464_v14, %v951_v7 }
 0x36a   : > { %v459_v17 = vpop.permute.xlu0 %458 }
 0x36b   : > { %486 = vst [vmem:[%s188_s28 + $0x10] sm:$0xff] %v478_v15  ;;  %487 = vst [vmem:[%s188_s28 + $0x18] sm:$0xff] %v479_v16  ;;  %v476_v18 = vmul.f32 %v459_v17, %v957_v10  ;;  %v477_v19 = vmul.f32 %v459_v17, %v959_v11 }
 0x36d   : > { %484 = vst [vmem:[%s188_s28] sm:$0xff] %v476_v18  ;;  %485 = vst [vmem:[%s188_s28 + $0x8] sm:$0xff] %v477_v19 }
 0x36e   : > { %v469_v20 = vpop.permute.xlu1 %468 }
 0x36f   : > { %v480_v21 = vmul.f32 %v469_v20, %v941_v2  ;;  %v481_v6 = vmul.f32 %v469_v20, %v947_v5 }
 0x371   : > { %488 = vst [vmem:[%s188_s28 + $0x20] sm:$0xff] %v480_v21  ;;  %489 = vst [vmem:[%s188_s28 + $0x28] sm:$0xff] %v481_v6 }
 0x372   : > { %v474_v7 = vpop.permute.xlu0 %473 }
 0x373   : > { %v482_v10 = vmul.f32 %v474_v7, %v937_v0  ;;  %v483_v2 = vmul.f32 %v474_v7, %v939_v1 }
 0x375   : > { %490 = vst [vmem:[%s188_s28 + $0x30] sm:$0xff] %v482_v10  ;;  %491 = vst [vmem:[%s188_s28 + $0x38] sm:$0xff] %v483_v2 }
 0x376   : > { %747 = shalt.err (!%p744_p10)
}
 0x377   : > { %s748_s8 = scalar_lea.hbm %s1002_s11, 1024  ;;  %s752_s20 = scalar_lea.hbm %s1050_s3, 2048 }
 0x378   : > { %p749_p0 = scmp.ne.s32.totalorder %s1002_s11, %s748_s8  ;;  %p753_p1 = scmp.lt.s32.totalorder %s1002_s11, %s1050_s3 }
 0x379   : > { %p754_p3 = scmp.lt.s32.totalorder %s752_s20, %s748_s8 }
 0x37a   : > { %p750_p2 = pnand %p749_p0, %p1059_p12 }
 0x37b   : > { %p755_p6 = por %p754_p3, %p753_p1 }
 0x37c   : > { %p751_p9 = pneg %p750_p2 }
 0x37e   : > { %p756_p11 = pnand %p755_p6, %p751_p9 }
 0x380   : > { %759 = shalt.err (!%p756_p11)
}
 0x381   : > { %s808_s27 = smov 256   ;;  %s809_s28 = smov 16  }
 0x382   : > { %636 = dma.vmem_to_hbm [thread:$0]  (%p1059_p12), %s997_s29, 1024, %s1002_s11, %s493_s16, %s808_s27, %s808_s27, %s809_s28  }
 0x383 PF: > { %s521_s30 = sand.u32 1, %s786_s12   ;;  %p1060_p13 = scmp.ne.s32.totalorder %s1056_s25, 0 }
 0x384   : > { %p1061_p4 = scmp.ge.s32.totalorder %s798_s15, 2  ;;  %s522_s9 = scalar_lea.sflag [#allocation4], %s521_s30 }
 0x386   : > { %p643_p5 = pnand %p1061_p4, %p1060_p13 }
 0x388   : > { %p644_p7 = pneg %p643_p5 }
 0x38a   : > { %781 = dma.done.wait (%p644_p7), %s522_s9, 1024  }
 0x38b   : > { %783 = vsyncadd (%p644_p7), %s522_s9, 4294966272  ;;  %p16_p8 = scmp.ge.s32.totalorder %s855_s18, 4   ;;  %s1062_s12 = smov %s790_s13 }
 0x38c   : > { %s1063_s13 = smov %s794_s14  ;;  %s1064_s14 = smov %s867_s21 }
 0x38d   : > { %s1065_s15 = smov %s855_s18  ;;  %18 = sbr.rel (!%p16_p8) target bundleno = 5 (0x5), region = 77 }
 0x392   :  { %527 = vsyncpa [#allocation3], 1 }
 0x393   :  { %529 = vsyncpa [#allocation3 + $0x1], 1 }
 0x394   :  { %530 = vsyncpa [#allocation4], 1 }
 0x395   :  { %532 = vsyncpa [#allocation4 + $0x1], 1 }

</bundles_post_ra>
